<compile_context>
chip_gen: v7x
topology: tpu7x:2x2x1
jax: 0.10.0
libtpu: 0.0.40
codegen_flags: <defaults>
</compile_context>

<pallas_src>
import functools

import jax
import jax.numpy as jnp
from jax.experimental import pallas as pl
from jax.experimental.pallas import tpu as pltpu

# ---------------- config (small, deterministic) ----------------
N_VOCAB = 32
EMBED_DIM = 16
NUM_FILTERS = 8
NUM_CLASSES = 4
SEQ_LEN = 8
BATCH = 2


# ---------------- Pallas kernel ----------------
def dpcnn_kernel(embed_ref, wr_ref, br_ref, wc_ref, bc_ref, wf_ref, bf_ref,
                 out_ref, pbuf):
    """Entire DPCNN forward (after the embedding gather) in one kernel invocation.

    embed_ref : (B, L, E)       token embeddings (channels on the lane axis)
    wr_ref    : (3*E, NF)       conv_region weight, tap-stacked matmul form
    br_ref    : (1, NF)         conv_region bias
    wc_ref    : (3*NF, NF)      conv weight, tap-stacked matmul form
    bc_ref    : (1, NF)         conv bias
    wf_ref    : (NF, NC)        fc weight (transposed)
    bf_ref    : (1, NC)         fc bias
    out_ref   : (B, NC)         logits
    pbuf      : (B, L, NF)      VMEM scratch used for zero-padded conv / pool inputs
    """
    B, L, E = embed_ref.shape
    NF = wc_ref.shape[1]
    wc = wc_ref[...]
    bc = bc_ref[...]

    def conv3(lhs_bh3c, w, b):
        # fused k=3 conv as a single 2-D matmul: (B*H, 3*Cin) @ (3*Cin, Cout)
        Bx, H, _ = lhs_bh3c.shape
        lhs2d = lhs_bh3c.reshape(Bx * H, lhs_bh3c.shape[-1])
        y = jnp.dot(lhs2d, w, preferred_element_type=jnp.float32) + b
        return y.reshape(Bx, H, w.shape[-1])

    def same_conv_relu(x):
        # conv_valid(pad_top_bottom(relu(x)))  ==  PyTorch padding1 -> relu -> conv
        Bx, H, C = x.shape
        zrow = jnp.zeros((Bx, 1, C), jnp.float32)
        pbuf[:, 0:1, :] = zrow                        # top zero-pad row
        pbuf[:, 1:H + 1, :] = jnp.maximum(x, 0.0)     # ReLU fused before padding
        pbuf[:, H + 1:H + 2, :] = zrow                # bottom zero-pad row
        lhs = jnp.concatenate(                        # tap-stacked LHS, built once
            [pbuf[:, 0:H, :], pbuf[:, 1:H + 1, :], pbuf[:, 2:H + 2, :]], axis=-1)
        return conv3(lhs, wc, bc)

    def pool(x):
        # PyTorch padding2 (one zero row at bottom) + MaxPool2d((3,1), stride=2)
        Bx, H, C = x.shape
        P = (H - 2) // 2 + 1
        pbuf[:, 0:H, :] = x
        pbuf[:, H:H + 1, :] = jnp.zeros((Bx, 1, C), jnp.float32)
        a = pbuf[:, pl.ds(0, P, stride=2), :]         # rows 0, 2, ..., 2P-2
        b = pbuf[:, pl.ds(1, P, stride=2), :]         # rows 1, 3, ..., 2P-1
        c = pbuf[:, pl.ds(2, P, stride=2), :]         # rows 2, 4, ..., 2P
        return jnp.maximum(jnp.maximum(a, b), c)

    # conv_region: valid k=3 conv over the embeddings, one fused matmul
    embed = embed_ref[...]
    H0 = L - 2
    lhs0 = jnp.concatenate(
        [embed[:, 0:H0, :], embed[:, 1:H0 + 1, :], embed[:, 2:H0 + 2, :]], axis=-1)
    out = conv3(lhs0, wr_ref[...], br_ref[...])       # (B, L-2, NF)

    out = same_conv_relu(out)                          # padding1 -> relu -> conv
    out = same_conv_relu(out)                          # padding1 -> relu -> conv

    # pyramid: heights are static so this unrolls at trace time.
    # TODO(synk): for long sequences replace with a fori_loop over a max-height scratch.
    while out.shape[1] >= 2:
        px = pool(out)                                 # padding2 + max_pool
        x = same_conv_relu(px)
        x = same_conv_relu(x)
        out = x + px                                   # residual

    feat = out.reshape(B, NF)                          # final height is always 1
    logits = jnp.dot(feat, wf_ref[...],
                     preferred_element_type=jnp.float32) + bf_ref[...]
    out_ref[...] = logits.astype(out_ref.dtype)


# ---------------- wrapper ----------------
def dpcnn_forward(tokens, params):
    emb_table, w_region, b_region, w_conv, b_conv, w_fc, b_fc = params
    E = emb_table.shape[1]
    NF = w_conv.shape[0]
    NC = w_fc.shape[0]
    B, L = tokens.shape

    # glue: embedding lookup (gather) + weight re-layout to tap-stacked matmul form
    embed = jnp.take(emb_table, tokens, axis=0)                          # (B, L, E)
    wr = jnp.transpose(w_region[:, 0, :, :], (1, 2, 0)).reshape(3 * E, NF)
    wc = jnp.transpose(w_conv[:, :, :, 0], (2, 1, 0)).reshape(3 * NF, NF)
    wf = jnp.transpose(w_fc)                                             # (NF, NC)

    vmem_spec = functools.partial(pl.BlockSpec, memory_space=pltpu.MemorySpace.VMEM)
    return pl.pallas_call(
        dpcnn_kernel,
        out_shape=jax.ShapeDtypeStruct((B, NC), jnp.float32),
        in_specs=[vmem_spec() for _ in range(7)],
        out_specs=vmem_spec(),
        scratch_shapes=[pltpu.VMEM((B, L, NF), jnp.float32)],  # padded-height scratch
    )(embed, wr, b_region.reshape(1, NF), wc, b_conv.reshape(1, NF),
      wf, b_fc.reshape(1, NC))


# ---------------- pure-JAX reference (mirrors the PyTorch NCHW code) ----------------
def dpcnn_reference(tokens, params):
    emb_table, w_region, b_region, w_conv, b_conv, w_fc, b_fc = params
    embed = jnp.take(emb_table, tokens, axis=0)              # (B, L, E)
    out = embed[:, None, :, :]                               # (B, 1, L, E)  NCHW

    def conv2d(x, w, b):
        dn = jax.lax.conv_dimension_numbers(x.shape, w.shape, ("NCHW", "OIHW", "NCHW"))
        y = jax.lax.conv_general_dilated(x, w, (1, 1), "VALID", dimension_numbers=dn)
        return y + b[None, :, None, None]

    def pad1(x):  # ZeroPad2d((0,0,1,1))
        return jnp.pad(x, ((0, 0), (0, 0), (1, 1), (0, 0)))

    def pad2(x):  # ZeroPad2d((0,0,0,1))
        return jnp.pad(x, ((0, 0), (0, 0), (0, 1), (0, 0)))

    def maxpool(x):  # MaxPool2d(kernel=(3,1), stride=2)
        return jax.lax.reduce_window(x, -jnp.inf, jax.lax.max,
                                     (1, 1, 3, 1), (1, 1, 2, 2), "VALID")

    out = conv2d(out, w_region, b_region)
    out = pad1(out); out = jnp.maximum(out, 0.0); out = conv2d(out, w_conv, b_conv)
    out = pad1(out); out = jnp.maximum(out, 0.0); out = conv2d(out, w_conv, b_conv)
    while out.shape[2] >= 2:
        x = pad2(out)
        px = maxpool(x)
        x = pad1(px); x = jnp.maximum(x, 0.0); x = conv2d(x, w_conv, b_conv)
        x = pad1(x);  x = jnp.maximum(x, 0.0); x = conv2d(x, w_conv, b_conv)
        out = x + px
    feat = out.reshape(out.shape[0], out.shape[1])           # squeeze
    return feat @ w_fc.T + b_fc


# ---------------- parameter init (deterministic, synthetic) ----------------
def init_params(key):
    ks = jax.random.split(key, 7)
    emb_table = 0.1 * jax.random.normal(ks[0], (N_VOCAB, EMBED_DIM), jnp.float32)
    emb_table = emb_table.at[N_VOCAB - 1].set(0.0)           # padding_idx row is zero
    w_region = 0.1 * jax.random.normal(ks[1], (NUM_FILTERS, 1, 3, EMBED_DIM), jnp.float32)
    b_region = 0.1 * jax.random.normal(ks[2], (NUM_FILTERS,), jnp.float32)
    w_conv = 0.1 * jax.random.normal(ks[3], (NUM_FILTERS, NUM_FILTERS, 3, 1), jnp.float32)
    b_conv = 0.1 * jax.random.normal(ks[4], (NUM_FILTERS,), jnp.float32)
    w_fc = 0.1 * jax.random.normal(ks[5], (NUM_CLASSES, NUM_FILTERS), jnp.float32)
    b_fc = 0.1 * jax.random.normal(ks[6], (NUM_CLASSES,), jnp.float32)
    return emb_table, w_region, b_region, w_conv, b_conv, w_fc, b_fc


if __name__ == "__main__":
    key = jax.random.PRNGKey(0)
    k_tok, k_par = jax.random.split(key)
    tokens = jax.random.randint(k_tok, (BATCH, SEQ_LEN), 0, N_VOCAB, dtype=jnp.int32)
    params = init_params(k_par)

    out = jax.block_until_ready(jax.jit(dpcnn_forward)(tokens, params))
    ref = jax.block_until_ready(jax.jit(dpcnn_reference)(tokens, params))

    assert out.shape == (BATCH, NUM_CLASSES)
    assert jnp.allclose(out, ref, atol=1e-4, rtol=1e-4), (out, ref)
    print("KERNEL_OK")
</pallas_src>

<mosaic_0001>
module attributes {stable_mosaic.version = 11 : i64} {
  func.func @dpcnn_kernel(%arg0: memref<2x8x16xf32, #tpu.memory_space<vmem>>, %arg1: memref<48x8xf32, #tpu.memory_space<vmem>>, %arg2: memref<1x8xf32, #tpu.memory_space<vmem>>, %arg3: memref<24x8xf32, #tpu.memory_space<vmem>>, %arg4: memref<1x8xf32, #tpu.memory_space<vmem>>, %arg5: memref<8x4xf32, #tpu.memory_space<vmem>>, %arg6: memref<1x4xf32, #tpu.memory_space<vmem>>, %arg7: memref<2x4xf32, #tpu.memory_space<vmem>>, %arg8: memref<2x8x8xf32, #tpu.memory_space<vmem>>) attributes {dimension_semantics = [], scalar_prefetch = 0 : i64, scratch_operands = 1 : i64, tpu.core_type = #tpu.core_type<tc>} {
    %c0 = arith.constant 0 : index
    %c0_0 = arith.constant 0 : index
    %0 = vector.load %arg3[%c0, %c0_0] : memref<24x8xf32, #tpu.memory_space<vmem>>, vector<24x8xf32>
    %c0_1 = arith.constant 0 : index
    %c0_2 = arith.constant 0 : index
    %1 = vector.load %arg4[%c0_1, %c0_2] : memref<1x8xf32, #tpu.memory_space<vmem>>, vector<1x8xf32>
    %c0_3 = arith.constant 0 : index
    %c0_4 = arith.constant 0 : index
    %c0_5 = arith.constant 0 : index
    %2 = vector.load %arg0[%c0_3, %c0_4, %c0_5] : memref<2x8x16xf32, #tpu.memory_space<vmem>>, vector<2x8x16xf32>
    %3 = vector.extract_strided_slice %2 {offsets = [0, 0, 0], sizes = [2, 6, 16], strides = [1, 1, 1]} : vector<2x8x16xf32> to vector<2x6x16xf32>
    %4 = vector.extract_strided_slice %2 {offsets = [0, 1, 0], sizes = [2, 6, 16], strides = [1, 1, 1]} : vector<2x8x16xf32> to vector<2x6x16xf32>
    %5 = vector.extract_strided_slice %2 {offsets = [0, 2, 0], sizes = [2, 6, 16], strides = [1, 1, 1]} : vector<2x8x16xf32> to vector<2x6x16xf32>
    %6 = tpu.concatenate %3, %4, %5 in 2 : vector<2x6x16xf32>, vector<2x6x16xf32>, vector<2x6x16xf32> -> vector<2x6x48xf32>
    %c0_6 = arith.constant 0 : index
    %c0_7 = arith.constant 0 : index
    %7 = vector.load %arg1[%c0_6, %c0_7] : memref<48x8xf32, #tpu.memory_space<vmem>>, vector<48x8xf32>
    %c0_8 = arith.constant 0 : index
    %c0_9 = arith.constant 0 : index
    %8 = vector.load %arg2[%c0_8, %c0_9] : memref<1x8xf32, #tpu.memory_space<vmem>>, vector<1x8xf32>
    %9 = vector.shape_cast %6 : vector<2x6x48xf32> to vector<12x48xf32>
    %cst = arith.constant dense<0.000000e+00> : vector<12x8xf32>
    %10 = tpu.matmul %9, %7, %cst {dimension_numbers = #tpu.dot_dimension_numbers<[1], [0], [0], [1], [0, 0, 1, 1], [], []>} : vector<12x48xf32>, vector<48x8xf32>, vector<12x8xf32> -> vector<12x8xf32>
    %11 = vector.broadcast %8 : vector<1x8xf32> to vector<12x8xf32>
    %12 = arith.addf %10, %11 : vector<12x8xf32>
    %13 = vector.shape_cast %12 : vector<12x8xf32> to vector<2x6x8xf32>
    %cst_10 = arith.constant 0.000000e+00 : f32
    %14 = vector.broadcast %cst_10 : f32 to vector<2x1x8xf32>
    %c0_11 = arith.constant 0 : index
    %c0_12 = arith.constant 0 : index
    %c0_13 = arith.constant 0 : index
    %15 = vector.load %arg8[%c0_11, %c0_12, %c0_13] : memref<2x8x8xf32, #tpu.memory_space<vmem>>, vector<2x1x8xf32>
    tpu.vector_store %arg8[%c0_11, %c0_12, %c0_13], %14 {strides = array<i32>} : memref<2x8x8xf32, #tpu.memory_space<vmem>>, vector<2x1x8xf32>,
    %cst_14 = arith.constant 0.000000e+00 : f32
    %16 = vector.broadcast %cst_14 : f32 to vector<2x6x8xf32>
    %17 = arith.maximumf %13, %16 : vector<2x6x8xf32>
    %c0_15 = arith.constant 0 : index
    %c1 = arith.constant 1 : index
    %c0_16 = arith.constant 0 : index
    %18 = vector.load %arg8[%c0_15, %c1, %c0_16] : memref<2x8x8xf32, #tpu.memory_space<vmem>>, vector<2x6x8xf32>
    tpu.vector_store %arg8[%c0_15, %c1, %c0_16], %17 {strides = array<i32>} : memref<2x8x8xf32, #tpu.memory_space<vmem>>, vector<2x6x8xf32>,
    %c0_17 = arith.constant 0 : index
    %c7 = arith.constant 7 : index
    %c0_18 = arith.constant 0 : index
    %19 = vector.load %arg8[%c0_17, %c7, %c0_18] : memref<2x8x8xf32, #tpu.memory_space<vmem>>, vector<2x1x8xf32>
    tpu.vector_store %arg8[%c0_17, %c7, %c0_18], %14 {strides = array<i32>} : memref<2x8x8xf32, #tpu.memory_space<vmem>>, vector<2x1x8xf32>,
    %c0_19 = arith.constant 0 : index
    %c0_20 = arith.constant 0 : index
    %c0_21 = arith.constant 0 : index
    %20 = vector.load %arg8[%c0_19, %c0_20, %c0_21] : memref<2x8x8xf32, #tpu.memory_space<vmem>>, vector<2x6x8xf32>
    %c0_22 = arith.constant 0 : index
    %c1_23 = arith.constant 1 : index
    %c0_24 = arith.constant 0 : index
    %21 = vector.load %arg8[%c0_22, %c1_23, %c0_24] : memref<2x8x8xf32, #tpu.memory_space<vmem>>, vector<2x6x8xf32>
    %c0_25 = arith.constant 0 : index
    %c2 = arith.constant 2 : index
    %c0_26 = arith.constant 0 : index
    %22 = vector.load %arg8[%c0_25, %c2, %c0_26] : memref<2x8x8xf32, #tpu.memory_space<vmem>>, vector<2x6x8xf32>
    %23 = tpu.concatenate %20, %21, %22 in 2 : vector<2x6x8xf32>, vector<2x6x8xf32>, vector<2x6x8xf32> -> vector<2x6x24xf32>
    %24 = vector.shape_cast %23 : vector<2x6x24xf32> to vector<12x24xf32>
    %cst_27 = arith.constant dense<0.000000e+00> : vector<12x8xf32>
    %25 = tpu.matmul %24, %0, %cst_27 {dimension_numbers = #tpu.dot_dimension_numbers<[1], [0], [0], [1], [0, 0, 1, 1], [], []>} : vector<12x24xf32>, vector<24x8xf32>, vector<12x8xf32> -> vector<12x8xf32>
    %26 = vector.broadcast %1 : vector<1x8xf32> to vector<12x8xf32>
    %27 = arith.addf %25, %26 : vector<12x8xf32>
    %28 = vector.shape_cast %27 : vector<12x8xf32> to vector<2x6x8xf32>
    %cst_28 = arith.constant 0.000000e+00 : f32
    %29 = vector.broadcast %cst_28 : f32 to vector<2x1x8xf32>
    %c0_29 = arith.constant 0 : index
    %c0_30 = arith.constant 0 : index
    %c0_31 = arith.constant 0 : index
    %30 = vector.load %arg8[%c0_29, %c0_30, %c0_31] : memref<2x8x8xf32, #tpu.memory_space<vmem>>, vector<2x1x8xf32>
    tpu.vector_store %arg8[%c0_29, %c0_30, %c0_31], %29 {strides = array<i32>} : memref<2x8x8xf32, #tpu.memory_space<vmem>>, vector<2x1x8xf32>,
    %cst_32 = arith.constant 0.000000e+00 : f32
    %31 = vector.broadcast %cst_32 : f32 to vector<2x6x8xf32>
    %32 = arith.maximumf %28, %31 : vector<2x6x8xf32>
    %c0_33 = arith.constant 0 : index
    %c1_34 = arith.constant 1 : index
    %c0_35 = arith.constant 0 : index
    %33 = vector.load %arg8[%c0_33, %c1_34, %c0_35] : memref<2x8x8xf32, #tpu.memory_space<vmem>>, vector<2x6x8xf32>
    tpu.vector_store %arg8[%c0_33, %c1_34, %c0_35], %32 {strides = array<i32>} : memref<2x8x8xf32, #tpu.memory_space<vmem>>, vector<2x6x8xf32>,
    %c0_36 = arith.constant 0 : index
    %c7_37 = arith.constant 7 : index
    %c0_38 = arith.constant 0 : index
    %34 = vector.load %arg8[%c0_36, %c7_37, %c0_38] : memref<2x8x8xf32, #tpu.memory_space<vmem>>, vector<2x1x8xf32>
    tpu.vector_store %arg8[%c0_36, %c7_37, %c0_38], %29 {strides = array<i32>} : memref<2x8x8xf32, #tpu.memory_space<vmem>>, vector<2x1x8xf32>,
    %c0_39 = arith.constant 0 : index
    %c0_40 = arith.constant 0 : index
    %c0_41 = arith.constant 0 : index
    %35 = vector.load %arg8[%c0_39, %c0_40, %c0_41] : memref<2x8x8xf32, #tpu.memory_space<vmem>>, vector<2x6x8xf32>
    %c0_42 = arith.constant 0 : index
    %c1_43 = arith.constant 1 : index
    %c0_44 = arith.constant 0 : index
    %36 = vector.load %arg8[%c0_42, %c1_43, %c0_44] : memref<2x8x8xf32, #tpu.memory_space<vmem>>, vector<2x6x8xf32>
    %c0_45 = arith.constant 0 : index
    %c2_46 = arith.constant 2 : index
    %c0_47 = arith.constant 0 : index
    %37 = vector.load %arg8[%c0_45, %c2_46, %c0_47] : memref<2x8x8xf32, #tpu.memory_space<vmem>>, vector<2x6x8xf32>
    %38 = tpu.concatenate %35, %36, %37 in 2 : vector<2x6x8xf32>, vector<2x6x8xf32>, vector<2x6x8xf32> -> vector<2x6x24xf32>
    %39 = vector.shape_cast %38 : vector<2x6x24xf32> to vector<12x24xf32>
    %cst_48 = arith.constant dense<0.000000e+00> : vector<12x8xf32>
    %40 = tpu.matmul %39, %0, %cst_48 {dimension_numbers = #tpu.dot_dimension_numbers<[1], [0], [0], [1], [0, 0, 1, 1], [], []>} : vector<12x24xf32>, vector<24x8xf32>, vector<12x8xf32> -> vector<12x8xf32>
    %41 = vector.broadcast %1 : vector<1x8xf32> to vector<12x8xf32>
    %42 = arith.addf %40, %41 : vector<12x8xf32>
    %43 = vector.shape_cast %42 : vector<12x8xf32> to vector<2x6x8xf32>
    %c0_49 = arith.constant 0 : index
    %c0_50 = arith.constant 0 : index
    %c0_51 = arith.constant 0 : index
    %44 = vector.load %arg8[%c0_49, %c0_50, %c0_51] : memref<2x8x8xf32, #tpu.memory_space<vmem>>, vector<2x6x8xf32>
    tpu.vector_store %arg8[%c0_49, %c0_50, %c0_51], %43 {strides = array<i32>} : memref<2x8x8xf32, #tpu.memory_space<vmem>>, vector<2x6x8xf32>,
    %cst_52 = arith.constant 0.000000e+00 : f32
    %45 = vector.broadcast %cst_52 : f32 to vector<2x1x8xf32>
    %c0_53 = arith.constant 0 : index
    %c6 = arith.constant 6 : index
    %c0_54 = arith.constant 0 : index
    %46 = vector.load %arg8[%c0_53, %c6, %c0_54] : memref<2x8x8xf32, #tpu.memory_space<vmem>>, vector<2x1x8xf32>
    tpu.vector_store %arg8[%c0_53, %c6, %c0_54], %45 {strides = array<i32>} : memref<2x8x8xf32, #tpu.memory_space<vmem>>, vector<2x1x8xf32>,
    %c0_55 = arith.constant 0 : index
    %c0_56 = arith.constant 0 : index
    %c0_57 = arith.constant 0 : index
    %47 = tpu.strided_load %arg8[%c0_55, %c0_56, %c0_57] {strides = array<i32: 1, 2, 1>} : memref<2x8x8xf32, #tpu.memory_space<vmem>>, vector<2x3x8xf32>
    %c0_58 = arith.constant 0 : index
    %c1_59 = arith.constant 1 : index
    %c0_60 = arith.constant 0 : index
    %48 = tpu.strided_load %arg8[%c0_58, %c1_59, %c0_60] {strides = array<i32: 1, 2, 1>} : memref<2x8x8xf32, #tpu.memory_space<vmem>>, vector<2x3x8xf32>
    %c0_61 = arith.constant 0 : index
    %c2_62 = arith.constant 2 : index
    %c0_63 = arith.constant 0 : index
    %49 = tpu.strided_load %arg8[%c0_61, %c2_62, %c0_63] {strides = array<i32: 1, 2, 1>} : memref<2x8x8xf32, #tpu.memory_space<vmem>>, vector<2x3x8xf32>
    %50 = arith.maximumf %47, %48 : vector<2x3x8xf32>
    %51 = arith.maximumf %50, %49 : vector<2x3x8xf32>
    %cst_64 = arith.constant 0.000000e+00 : f32
    %52 = vector.broadcast %cst_64 : f32 to vector<2x1x8xf32>
    %c0_65 = arith.constant 0 : index
    %c0_66 = arith.constant 0 : index
    %c0_67 = arith.constant 0 : index
    %53 = vector.load %arg8[%c0_65, %c0_66, %c0_67] : memref<2x8x8xf32, #tpu.memory_space<vmem>>, vector<2x1x8xf32>
    tpu.vector_store %arg8[%c0_65, %c0_66, %c0_67], %52 {strides = array<i32>} : memref<2x8x8xf32, #tpu.memory_space<vmem>>, vector<2x1x8xf32>,
    %cst_68 = arith.constant 0.000000e+00 : f32
    %54 = vector.broadcast %cst_68 : f32 to vector<2x3x8xf32>
    %55 = arith.maximumf %51, %54 : vector<2x3x8xf32>
    %c0_69 = arith.constant 0 : index
    %c1_70 = arith.constant 1 : index
    %c0_71 = arith.constant 0 : index
    %56 = vector.load %arg8[%c0_69, %c1_70, %c0_71] : memref<2x8x8xf32, #tpu.memory_space<vmem>>, vector<2x3x8xf32>
    tpu.vector_store %arg8[%c0_69, %c1_70, %c0_71], %55 {strides = array<i32>} : memref<2x8x8xf32, #tpu.memory_space<vmem>>, vector<2x3x8xf32>,
    %c0_72 = arith.constant 0 : index
    %c4 = arith.constant 4 : index
    %c0_73 = arith.constant 0 : index
    %57 = vector.load %arg8[%c0_72, %c4, %c0_73] : memref<2x8x8xf32, #tpu.memory_space<vmem>>, vector<2x1x8xf32>
    tpu.vector_store %arg8[%c0_72, %c4, %c0_73], %52 {strides = array<i32>} : memref<2x8x8xf32, #tpu.memory_space<vmem>>, vector<2x1x8xf32>,
    %c0_74 = arith.constant 0 : index
    %c0_75 = arith.constant 0 : index
    %c0_76 = arith.constant 0 : index
    %58 = vector.load %arg8[%c0_74, %c0_75, %c0_76] : memref<2x8x8xf32, #tpu.memory_space<vmem>>, vector<2x3x8xf32>
    %c0_77 = arith.constant 0 : index
    %c1_78 = arith.constant 1 : index
    %c0_79 = arith.constant 0 : index
    %59 = vector.load %arg8[%c0_77, %c1_78, %c0_79] : memref<2x8x8xf32, #tpu.memory_space<vmem>>, vector<2x3x8xf32>
    %c0_80 = arith.constant 0 : index
    %c2_81 = arith.constant 2 : index
    %c0_82 = arith.constant 0 : index
    %60 = vector.load %arg8[%c0_80, %c2_81, %c0_82] : memref<2x8x8xf32, #tpu.memory_space<vmem>>, vector<2x3x8xf32>
    %61 = tpu.concatenate %58, %59, %60 in 2 : vector<2x3x8xf32>, vector<2x3x8xf32>, vector<2x3x8xf32> -> vector<2x3x24xf32>
    %62 = vector.shape_cast %61 : vector<2x3x24xf32> to vector<6x24xf32>
    %cst_83 = arith.constant dense<0.000000e+00> : vector<6x8xf32>
    %63 = tpu.matmul %62, %0, %cst_83 {dimension_numbers = #tpu.dot_dimension_numbers<[1], [0], [0], [1], [0, 0, 1, 1], [], []>} : vector<6x24xf32>, vector<24x8xf32>, vector<6x8xf32> -> vector<6x8xf32>
    %64 = vector.broadcast %1 : vector<1x8xf32> to vector<6x8xf32>
    %65 = arith.addf %63, %64 : vector<6x8xf32>
    %66 = vector.shape_cast %65 : vector<6x8xf32> to vector<2x3x8xf32>
    %cst_84 = arith.constant 0.000000e+00 : f32
    %67 = vector.broadcast %cst_84 : f32 to vector<2x1x8xf32>
    %c0_85 = arith.constant 0 : index
    %c0_86 = arith.constant 0 : index
    %c0_87 = arith.constant 0 : index
    %68 = vector.load %arg8[%c0_85, %c0_86, %c0_87] : memref<2x8x8xf32, #tpu.memory_space<vmem>>, vector<2x1x8xf32>
    tpu.vector_store %arg8[%c0_85, %c0_86, %c0_87], %67 {strides = array<i32>} : memref<2x8x8xf32, #tpu.memory_space<vmem>>, vector<2x1x8xf32>,
    %cst_88 = arith.constant 0.000000e+00 : f32
    %69 = vector.broadcast %cst_88 : f32 to vector<2x3x8xf32>
    %70 = arith.maximumf %66, %69 : vector<2x3x8xf32>
    %c0_89 = arith.constant 0 : index
    %c1_90 = arith.constant 1 : index
    %c0_91 = arith.constant 0 : index
    %71 = vector.load %arg8[%c0_89, %c1_90, %c0_91] : memref<2x8x8xf32, #tpu.memory_space<vmem>>, vector<2x3x8xf32>
    tpu.vector_store %arg8[%c0_89, %c1_90, %c0_91], %70 {strides = array<i32>} : memref<2x8x8xf32, #tpu.memory_space<vmem>>, vector<2x3x8xf32>,
    %c0_92 = arith.constant 0 : index
    %c4_93 = arith.constant 4 : index
    %c0_94 = arith.constant 0 : index
    %72 = vector.load %arg8[%c0_92, %c4_93, %c0_94] : memref<2x8x8xf32, #tpu.memory_space<vmem>>, vector<2x1x8xf32>
    tpu.vector_store %arg8[%c0_92, %c4_93, %c0_94], %67 {strides = array<i32>} : memref<2x8x8xf32, #tpu.memory_space<vmem>>, vector<2x1x8xf32>,
    %c0_95 = arith.constant 0 : index
    %c0_96 = arith.constant 0 : index
    %c0_97 = arith.constant 0 : index
    %73 = vector.load %arg8[%c0_95, %c0_96, %c0_97] : memref<2x8x8xf32, #tpu.memory_space<vmem>>, vector<2x3x8xf32>
    %c0_98 = arith.constant 0 : index
    %c1_99 = arith.constant 1 : index
    %c0_100 = arith.constant 0 : index
    %74 = vector.load %arg8[%c0_98, %c1_99, %c0_100] : memref<2x8x8xf32, #tpu.memory_space<vmem>>, vector<2x3x8xf32>
    %c0_101 = arith.constant 0 : index
    %c2_102 = arith.constant 2 : index
    %c0_103 = arith.constant 0 : index
    %75 = vector.load %arg8[%c0_101, %c2_102, %c0_103] : memref<2x8x8xf32, #tpu.memory_space<vmem>>, vector<2x3x8xf32>
    %76 = tpu.concatenate %73, %74, %75 in 2 : vector<2x3x8xf32>, vector<2x3x8xf32>, vector<2x3x8xf32> -> vector<2x3x24xf32>
    %77 = vector.shape_cast %76 : vector<2x3x24xf32> to vector<6x24xf32>
    %cst_104 = arith.constant dense<0.000000e+00> : vector<6x8xf32>
    %78 = tpu.matmul %77, %0, %cst_104 {dimension_numbers = #tpu.dot_dimension_numbers<[1], [0], [0], [1], [0, 0, 1, 1], [], []>} : vector<6x24xf32>, vector<24x8xf32>, vector<6x8xf32> -> vector<6x8xf32>
    %79 = vector.broadcast %1 : vector<1x8xf32> to vector<6x8xf32>
    %80 = arith.addf %78, %79 : vector<6x8xf32>
    %81 = vector.shape_cast %80 : vector<6x8xf32> to vector<2x3x8xf32>
    %82 = arith.addf %81, %51 : vector<2x3x8xf32>
    %c0_105 = arith.constant 0 : index
    %c0_106 = arith.constant 0 : index
    %c0_107 = arith.constant 0 : index
    %83 = vector.load %arg8[%c0_105, %c0_106, %c0_107] : memref<2x8x8xf32, #tpu.memory_space<vmem>>, vector<2x3x8xf32>
    tpu.vector_store %arg8[%c0_105, %c0_106, %c0_107], %82 {strides = array<i32>} : memref<2x8x8xf32, #tpu.memory_space<vmem>>, vector<2x3x8xf32>,
    %cst_108 = arith.constant 0.000000e+00 : f32
    %84 = vector.broadcast %cst_108 : f32 to vector<2x1x8xf32>
    %c0_109 = arith.constant 0 : index
    %c3 = arith.constant 3 : index
    %c0_110 = arith.constant 0 : index
    %85 = vector.load %arg8[%c0_109, %c3, %c0_110] : memref<2x8x8xf32, #tpu.memory_space<vmem>>, vector<2x1x8xf32>
    tpu.vector_store %arg8[%c0_109, %c3, %c0_110], %84 {strides = array<i32>} : memref<2x8x8xf32, #tpu.memory_space<vmem>>, vector<2x1x8xf32>,
    %c0_111 = arith.constant 0 : index
    %c0_112 = arith.constant 0 : index
    %c0_113 = arith.constant 0 : index
    %86 = tpu.strided_load %arg8[%c0_111, %c0_112, %c0_113] {strides = array<i32: 1, 2, 1>} : memref<2x8x8xf32, #tpu.memory_space<vmem>>, vector<2x1x8xf32>
    %c0_114 = arith.constant 0 : index
    %c1_115 = arith.constant 1 : index
    %c0_116 = arith.constant 0 : index
    %87 = tpu.strided_load %arg8[%c0_114, %c1_115, %c0_116] {strides = array<i32: 1, 2, 1>} : memref<2x8x8xf32, #tpu.memory_space<vmem>>, vector<2x1x8xf32>
    %c0_117 = arith.constant 0 : index
    %c2_118 = arith.constant 2 : index
    %c0_119 = arith.constant 0 : index
    %88 = tpu.strided_load %arg8[%c0_117, %c2_118, %c0_119] {strides = array<i32: 1, 2, 1>} : memref<2x8x8xf32, #tpu.memory_space<vmem>>, vector<2x1x8xf32>
    %89 = arith.maximumf %86, %87 : vector<2x1x8xf32>
    %90 = arith.maximumf %89, %88 : vector<2x1x8xf32>
    %cst_120 = arith.constant 0.000000e+00 : f32
    %91 = vector.broadcast %cst_120 : f32 to vector<2x1x8xf32>
    %c0_121 = arith.constant 0 : index
    %c0_122 = arith.constant 0 : index
    %c0_123 = arith.constant 0 : index
    %92 = vector.load %arg8[%c0_121, %c0_122, %c0_123] : memref<2x8x8xf32, #tpu.memory_space<vmem>>, vector<2x1x8xf32>
    tpu.vector_store %arg8[%c0_121, %c0_122, %c0_123], %91 {strides = array<i32>} : memref<2x8x8xf32, #tpu.memory_space<vmem>>, vector<2x1x8xf32>,
    %cst_124 = arith.constant 0.000000e+00 : f32
    %93 = vector.broadcast %cst_124 : f32 to vector<2x1x8xf32>
    %94 = arith.maximumf %90, %93 : vector<2x1x8xf32>
    %c0_125 = arith.constant 0 : index
    %c1_126 = arith.constant 1 : index
    %c0_127 = arith.constant 0 : index
    %95 = vector.load %arg8[%c0_125, %c1_126, %c0_127] : memref<2x8x8xf32, #tpu.memory_space<vmem>>, vector<2x1x8xf32>
    tpu.vector_store %arg8[%c0_125, %c1_126, %c0_127], %94 {strides = array<i32>} : memref<2x8x8xf32, #tpu.memory_space<vmem>>, vector<2x1x8xf32>,
    %c0_128 = arith.constant 0 : index
    %c2_129 = arith.constant 2 : index
    %c0_130 = arith.constant 0 : index
    %96 = vector.load %arg8[%c0_128, %c2_129, %c0_130] : memref<2x8x8xf32, #tpu.memory_space<vmem>>, vector<2x1x8xf32>
    tpu.vector_store %arg8[%c0_128, %c2_129, %c0_130], %91 {strides = array<i32>} : memref<2x8x8xf32, #tpu.memory_space<vmem>>, vector<2x1x8xf32>,
    %c0_131 = arith.constant 0 : index
    %c0_132 = arith.constant 0 : index
    %c0_133 = arith.constant 0 : index
    %97 = vector.load %arg8[%c0_131, %c0_132, %c0_133] : memref<2x8x8xf32, #tpu.memory_space<vmem>>, vector<2x1x8xf32>
    %c0_134 = arith.constant 0 : index
    %c1_135 = arith.constant 1 : index
    %c0_136 = arith.constant 0 : index
    %98 = vector.load %arg8[%c0_134, %c1_135, %c0_136] : memref<2x8x8xf32, #tpu.memory_space<vmem>>, vector<2x1x8xf32>
    %c0_137 = arith.constant 0 : index
    %c2_138 = arith.constant 2 : index
    %c0_139 = arith.constant 0 : index
    %99 = vector.load %arg8[%c0_137, %c2_138, %c0_139] : memref<2x8x8xf32, #tpu.memory_space<vmem>>, vector<2x1x8xf32>
    %100 = tpu.concatenate %97, %98, %99 in 2 : vector<2x1x8xf32>, vector<2x1x8xf32>, vector<2x1x8xf32> -> vector<2x1x24xf32>
    %101 = vector.shape_cast %100 : vector<2x1x24xf32> to vector<2x24xf32>
    %cst_140 = arith.constant dense<0.000000e+00> : vector<2x8xf32>
    %102 = tpu.matmul %101, %0, %cst_140 {dimension_numbers = #tpu.dot_dimension_numbers<[1], [0], [0], [1], [0, 0, 1, 1], [], []>} : vector<2x24xf32>, vector<24x8xf32>, vector<2x8xf32> -> vector<2x8xf32>
    %103 = vector.broadcast %1 : vector<1x8xf32> to vector<2x8xf32>
    %104 = arith.addf %102, %103 : vector<2x8xf32>
    %105 = vector.shape_cast %104 : vector<2x8xf32> to vector<2x1x8xf32>
    %cst_141 = arith.constant 0.000000e+00 : f32
    %106 = vector.broadcast %cst_141 : f32 to vector<2x1x8xf32>
    %c0_142 = arith.constant 0 : index
    %c0_143 = arith.constant 0 : index
    %c0_144 = arith.constant 0 : index
    %107 = vector.load %arg8[%c0_142, %c0_143, %c0_144] : memref<2x8x8xf32, #tpu.memory_space<vmem>>, vector<2x1x8xf32>
    tpu.vector_store %arg8[%c0_142, %c0_143, %c0_144], %106 {strides = array<i32>} : memref<2x8x8xf32, #tpu.memory_space<vmem>>, vector<2x1x8xf32>,
    %cst_145 = arith.constant 0.000000e+00 : f32
    %108 = vector.broadcast %cst_145 : f32 to vector<2x1x8xf32>
    %109 = arith.maximumf %105, %108 : vector<2x1x8xf32>
    %c0_146 = arith.constant 0 : index
    %c1_147 = arith.constant 1 : index
    %c0_148 = arith.constant 0 : index
    %110 = vector.load %arg8[%c0_146, %c1_147, %c0_148] : memref<2x8x8xf32, #tpu.memory_space<vmem>>, vector<2x1x8xf32>
    tpu.vector_store %arg8[%c0_146, %c1_147, %c0_148], %109 {strides = array<i32>} : memref<2x8x8xf32, #tpu.memory_space<vmem>>, vector<2x1x8xf32>,
    %c0_149 = arith.constant 0 : index
    %c2_150 = arith.constant 2 : index
    %c0_151 = arith.constant 0 : index
    %111 = vector.load %arg8[%c0_149, %c2_150, %c0_151] : memref<2x8x8xf32, #tpu.memory_space<vmem>>, vector<2x1x8xf32>
    tpu.vector_store %arg8[%c0_149, %c2_150, %c0_151], %106 {strides = array<i32>} : memref<2x8x8xf32, #tpu.memory_space<vmem>>, vector<2x1x8xf32>,
    %c0_152 = arith.constant 0 : index
    %c0_153 = arith.constant 0 : index
    %c0_154 = arith.constant 0 : index
    %112 = vector.load %arg8[%c0_152, %c0_153, %c0_154] : memref<2x8x8xf32, #tpu.memory_space<vmem>>, vector<2x1x8xf32>
    %c0_155 = arith.constant 0 : index
    %c1_156 = arith.constant 1 : index
    %c0_157 = arith.constant 0 : index
    %113 = vector.load %arg8[%c0_155, %c1_156, %c0_157] : memref<2x8x8xf32, #tpu.memory_space<vmem>>, vector<2x1x8xf32>
    %c0_158 = arith.constant 0 : index
    %c2_159 = arith.constant 2 : index
    %c0_160 = arith.constant 0 : index
    %114 = vector.load %arg8[%c0_158, %c2_159, %c0_160] : memref<2x8x8xf32, #tpu.memory_space<vmem>>, vector<2x1x8xf32>
    %115 = tpu.concatenate %112, %113, %114 in 2 : vector<2x1x8xf32>, vector<2x1x8xf32>, vector<2x1x8xf32> -> vector<2x1x24xf32>
    %116 = vector.shape_cast %115 : vector<2x1x24xf32> to vector<2x24xf32>
    %cst_161 = arith.constant dense<0.000000e+00> : vector<2x8xf32>
    %117 = tpu.matmul %116, %0, %cst_161 {dimension_numbers = #tpu.dot_dimension_numbers<[1], [0], [0], [1], [0, 0, 1, 1], [], []>} : vector<2x24xf32>, vector<24x8xf32>, vector<2x8xf32> -> vector<2x8xf32>
    %118 = vector.broadcast %1 : vector<1x8xf32> to vector<2x8xf32>
    %119 = arith.addf %117, %118 : vector<2x8xf32>
    %120 = vector.shape_cast %119 : vector<2x8xf32> to vector<2x1x8xf32>
    %121 = arith.addf %120, %90 : vector<2x1x8xf32>
    %122 = vector.shape_cast %121 : vector<2x1x8xf32> to vector<2x8xf32>
    %c0_162 = arith.constant 0 : index
    %c0_163 = arith.constant 0 : index
    %123 = vector.load %arg5[%c0_162, %c0_163] : memref<8x4xf32, #tpu.memory_space<vmem>>, vector<8x4xf32>
    %cst_164 = arith.constant dense<0.000000e+00> : vector<2x4xf32>
    %124 = tpu.matmul %122, %123, %cst_164 {dimension_numbers = #tpu.dot_dimension_numbers<[1], [0], [0], [1], [0, 0, 1, 1], [], []>} : vector<2x8xf32>, vector<8x4xf32>, vector<2x4xf32> -> vector<2x4xf32>
    %c0_165 = arith.constant 0 : index
    %c0_166 = arith.constant 0 : index
    %125 = vector.load %arg6[%c0_165, %c0_166] : memref<1x4xf32, #tpu.memory_space<vmem>>, vector<1x4xf32>
    %126 = vector.broadcast %125 : vector<1x4xf32> to vector<2x4xf32>
    %127 = arith.addf %124, %126 : vector<2x4xf32>
    %c0_167 = arith.constant 0 : index
    %c0_168 = arith.constant 0 : index
    %128 = vector.load %arg7[%c0_167, %c0_168] : memref<2x4xf32, #tpu.memory_space<vmem>>, vector<2x4xf32>
    tpu.vector_store %arg7[%c0_167, %c0_168], %127 {strides = array<i32>} : memref<2x4xf32, #tpu.memory_space<vmem>>, vector<2x4xf32>,
    return
  }
}

</mosaic_0001>

<bundles_post_ra>
// kernel: dpcnn_forward.1
= control target key start
LH: loop header
LB: loop body
LE: loop exit
PB: predicated region body
PF: predicated region fallthrough
CT: control target
= control target key end

     0   :  { %s2055_s14 = smov 16   ;;  %s2467_s0 = inlined_call_operand.vmem [shape: f32[2,8,16], index: 0, kind: input, shape index: {}]   ;;  %s2468_s1 = inlined_call_operand.vmem [shape: f32[48,8], index: 1, kind: input, shape index: {}]   ;;  %s2469_s2 = inlined_call_operand.vmem [shape: f32[1,8], index: 2, kind: input, shape index: {}]   ;;  %s2470_s3 = inlined_call_operand.vmem [shape: f32[24,8], index: 3, kind: input, shape index: {}]   ;;  %s2471_s4 = inlined_call_operand.vmem [shape: f32[1,8], index: 4, kind: input, shape index: {}]   ;;  %s2472_s5 = inlined_call_operand.vmem [shape: f32[8,4], index: 5, kind: input, shape index: {}]   ;;  %s2473_s6 = inlined_call_operand.vmem [shape: f32[1,4], index: 6, kind: input, shape index: {}]   ;;  %s2474_s7 = inlined_call_operand.hbm [shape: f32[2,4], index: 7, kind: output, shape index: {}]  }
   0x1   :  { %v32_v0 = vld [vmem:[%s2467_s0 + $0x8] sm:$0xff]  ;;  %v31_v1 = vld [vmem:[%s2467_s0] sm:$0xff]  ;;  %v59_v7 = vld [vmem:[%s2468_s1 + $0x10] sm:$0xff] }
   0x2   :  { %v36_v2 = vrot.slane %v32_v0, 1  ;;  %v35_v3 = vrot.slane %v31_v1, 1  ;;  %v57_v4 = vld [vmem:[%s2468_s1] sm:$0xff]  ;;  %v58_v5 = vld [vmem:[%s2468_s1 + $0x8] sm:$0xff]  ;;  %v60_v8 = vld [vmem:[%s2468_s1 + $0x18] sm:$0xff]  ;;  %v44_v10 = vrot.slane %v32_v0, 2 }
   0x3   :  { %v1990_v6 = vpack.c.bf16 %v58_v5, %v57_v4  ;;  %v61_v9 = vld [vmem:[%s2468_s1 + $0x20] sm:$0xff]  ;;  %v43_v11 = vrot.slane %v31_v1, 2  ;;  %v1994_v12 = vpack.c.bf16 %v60_v8, %v59_v7  ;;  %v62_v13 = vld [vmem:[%s2468_s1 + $0x28] sm:$0xff] }
   0x4   :  { %39 = vrot.lane.b32.xlu1 %v36_v2, %s2055_s14  ;;  %37 = vrot.lane.b32.xlu0 %v35_v3, %s2055_s14 }
   0x5   :  { %12 = vsyncpa [#allocation4], 0  ;;  %1991 = vmatprep.subr.bf16.mxu0 %v1990_v6  ;;  %v1998_v14 = vpack.c.bf16 %v62_v13, %v61_v9  ;;  %s2056_s17 = smov 32   ;;  %v2057_v15 = vmov 1983009808   ;;  %v70_v17 = vlaneseq  ;;  %vm51_vm0 = vcmask 130048  }
   0x6   :  { %1993 = vmatpush3.bf16.msra.mxu0 %v1990_v6  ;;  %v68_v16 = vunpack.c.l.s4 %v2057_v15  ;;  %vm54_vm1 = vcmask 261120   ;;  %vm129_vm2 = vcmask 392192   ;;  %vm242_vm3 = vcmask 57344   ;;  %v1866_v45 = vld [vmem:[%s2469_s2] ss:$0 sm:$0xff]  ;;  %v28_v8 = vld [vmem:[%s2470_s3 + $0x8] sm:$0xff] }
   0x7   :  { %1995 = vmatprep.subr.bf16.mxu0 %v1994_v12  ;;  %v2130_v19 = vshrl.u32 %v70_v17, 7  ;;  %v2058_v44 = vmov 0.0   ;;  %vm291_vm4 = vcmask 62464   ;;  %v27_v7 = vld [vmem:[%s2470_s3] sm:$0xff]  ;;  %s2059_s24 = smov 8   ;;  %vm318_vm5 = vcmask 64512  }
   0x8   :  { %47 = vrot.lane.b32.xlu1 %v44_v10, %s2056_s17  ;;  %45 = vrot.lane.b32.xlu0 %v43_v11, %s2056_s17  ;;  %v69_v18 = vunpack.c.0.s8 %v68_v16  ;;  %243 = vst.msk [vmem:[#allocation2] sm:$0x1] %vm242_vm3, %v2058_v44  ;;  %244 = vst.msk [vmem:[#allocation2 + $0x8] sm:$0x1] %vm242_vm3, %v2058_v44  ;;  %v2170_v9 = vpack.c.bf16 %v28_v8, %v27_v7  ;;  %v2177_v10 = vld [vmem:[%s2470_s3 + $0x10] sm:$0xff]  ;;  %vm388_vm6 = vcmask 195584  }
   0x9   :  { %294 = vst.msk [vmem:[#allocation2 + $0x7] sm:$0x1] %vm242_vm3, %v2058_v44  ;;  %295 = vst.msk [vmem:[#allocation2 + $0xf] sm:$0x1] %vm242_vm3, %v2058_v44  ;;  %vm801_vm7 = vcmask 59392   ;;  %vm2061_vm8 = vmmov 0  }
   0xa   :  { %1997 = vmatpush3.bf16.msra.mxu0 %v1994_v12  ;;  %v2134_v23 = vsub.s32 %v69_v18, %v2130_v19  ;;  %2003 = vmatprep.subr.bf16.mxu1 %v2170_v9  ;;  %vm1517_vm9 = vcmask 1041409   ;;  %s2063_s28 = smov [#allocation3]   ;;  %vm1850_vm10 = vcmask 25600  }
   0xb   :  { %1999 = vmatprep.subr.bf16.mxu0 %v1998_v14  ;;  %2005 = vmatpush3.bf16.msra.mxu1 %v2170_v9  ;;  %s1858_s29 = sshll.u32 %s2063_s28, 4  ;;  %s1859_s29 = int_to_ptr.vmem [resolvable:$true] %s1858_s29 }
   0xc   :  { %1935 = vmatprep.subr.mxu1 %v2177_v10  ;;  %s2031_s30 = scalar_lea.vmem %s1859_s29, 32  ;;  %p2036_p1 = scmp.lt.s32.totalorder %s1859_s29, %s1859_s29 }
   0xd   :  { %p2032_p0 = scmp.ne.s32.totalorder %s1859_s29, %s2031_s30  ;;  %p2037_p2 = scmp.lt.s32.totalorder %s2031_s30, %s2031_s30 }
   0xe   :  { %2001 = vmatpush3.bf16.msra.mxu0 %v1998_v14 }
   0xf   :  { %1936 = vmatpush3.msra.mxu1 %v2177_v10  ;;  %p2038_p3 = por %p2037_p2, %p2036_p1 }
  0x10   :  { %2007 = vmatprep.subr.bf16.mxu1 %v2170_v9 }
  0x11   :  { %p2039_p4 = pnand %p2038_p3, %p2032_p0 }
  0x76   :  { %v40_v20 = vpop.permute.xlu1 %39  ;;  %v38_v21 = vpop.permute.xlu0 %37 }
  0x77   :  { %v53_v22 = vsel %vm51_vm0, %v32_v0, %v40_v20  ;;  %v52_v24 = vsel %vm51_vm0, %v31_v1, %v38_v21 }
  0x7a   :  { %v48_v25 = vpop.permute.xlu1 %47  ;;  %v46_v26 = vpop.permute.xlu0 %45 }
  0x7b   :  { %v56_v27 = vsel %vm54_vm1, %v53_v22, %v48_v25  ;;  %v55_v28 = vsel %vm54_vm1, %v52_v24, %v46_v26 }
  0x7c   :  { %v82_v29 = vcombine.high %v56_v27, %v56_v27  ;;  %v89_v30 = vrot.slane %v56_v27, %v2134_v23  ;;  %v66_v31 = vcombine.high %v55_v28, %v55_v28  ;;  %v73_v32 = vrot.slane %v55_v28, %v2134_v23 }
  0x7e   :  { %v96_v33 = vrot.slane %v82_v29, %v2134_v23  ;;  %v97_v34 = vcombine.high %v89_v30, %v89_v30  ;;  %v80_v35 = vrot.slane %v66_v31, %v2134_v23  ;;  %v81_v36 = vcombine.high %v73_v32, %v73_v32 }
  0x80   :  { %v104_v37 = vcombine.low %v73_v32, %v81_v36  ;;  %v105_v38 = vcombine.low %v80_v35, %v89_v30  ;;  %v121_v39 = vcombine.low %v97_v34, %v96_v33 }
  0x82   :  { %v112_v40 = vrot.slane %v104_v37, %v2134_v23  ;;  %v119_v41 = vrot.slane %v105_v38, %v2134_v23  ;;  %v128_v43 = vrot.slane %v121_v39, %v2134_v23 }
  0x84   :  { %v120_v42 = vcombine.low %v112_v40, %v119_v41 }
  0x86   :  { %1928 = vmatprep.mubr.msk.f32.mxu0 %vm129_vm2, %v120_v42  ;;  %v2213_v42 = vld [vmem:[%s2471_s4] ss:$0 sm:$0xff] }
  0x87   :  { %1929 = vmatmul.mubr.msk.f32.vlgmr.msra.gmra.mrb[0].mxu0 %vm129_vm2, %v128_v43 }
  0x88   :  { %1955 = vmatprep.mubr.msk.f32.mxu0 %vm2061_vm8, %v2058_v44 }
 0x15a   :  { %v1930_v46 = vpop.f32.mrb[0].mxu0 }
 0x15b   :  { %v206_v47 = vadd.f32 %v1930_v46, %v1866_v45  ;;  %v200_v48 = vpop.f32.mrb[1].mxu0 }
 0x15c   :  { %v201_v49 = vadd.f32 %v1866_v45, %v200_v48 }
 0x15d   :  { %v234_v50 = vrot.slane %v206_v47, %v2134_v23 }
 0x15e   :  { %v211_v51 = vcombine.high %v201_v49, %v201_v49  ;;  %v218_v52 = vrot.slane %v201_v49, %v2134_v23 }
 0x15f   :  { %v235_v53 = vcombine.high %v234_v50, %v234_v50  ;;  %v249_v60 = vmax.f32 %v234_v50, 0.0 }
 0x160   :  { %v225_v54 = vrot.slane %v211_v51, %v2134_v23  ;;  %v226_v55 = vcombine.high %v218_v52, %v218_v52  ;;  %v245_v57 = vmax.f32 %v218_v52, 0.0 }
 0x161   :  { %v250_v61 = vmax.f32 %v235_v53, 0.0 }
 0x162   :  { %v227_v56 = vcombine.high %v225_v54, %v225_v54  ;;  %v246_v58 = vmax.f32 %v226_v55, 0.0  ;;  %v247_v59 = vmax.f32 %v225_v54, 0.0 }
 0x163   :  { %v287_v3 = vrot.slane %v250_v61, %v2134_v23 }
 0x164   :  { %v248_v62 = vmax.f32 %v227_v56, 0.0  ;;  %v257_v63 = vcombine.low %v245_v57, %v246_v58  ;;  %v271_v1 = vrot.slane %v247_v59, %v2134_v23 }
 0x166   :  { %v264_v0 = vrot.slane %v257_v63, %v2134_v23  ;;  %v273_v2 = vcombine.low %v248_v62, %v249_v60 }
 0x168   :  { %v272_v4 = vcombine.low %v264_v0, %v271_v1  ;;  %v280_v5 = vrot.slane %v273_v2, %v2134_v23 }
 0x16a   :  { %v288_v6 = vcombine.low %v280_v5, %v287_v3  ;;  %292 = vst.msk [vmem:[#allocation2 + $0x1] sm:$0x3f] %vm291_vm4, %v272_v4 }
 0x16c   :  { %293 = vst.msk [vmem:[#allocation2 + $0x9] sm:$0x3f] %vm291_vm4, %v288_v6 }
 0x171   :  { %v296_v11 = vld [vmem:[#allocation2] sm:$0x3f] }
 0x172   :  { %v298_v12 = vld [vmem:[#allocation2 + $0x1] sm:$0x3f]  ;;  %501 = vst.msk [vmem:[#allocation2] sm:$0x1] %vm242_vm3, %v2058_v44 }
 0x173   :  { %v300_v13 = vld [vmem:[#allocation2 + $0x2] sm:$0x3f]  ;;  %304 = vrot.lane.b32.xlu0 %v298_v12, %s2059_s24  ;;  %v297_v14 = vld [vmem:[#allocation2 + $0x8] sm:$0x3f] }
 0x174   :  { %312 = vrot.lane.b32.xlu1 %v300_v13, %s2055_s14  ;;  %551 = vst.msk [vmem:[#allocation2 + $0x7] sm:$0x1] %vm242_vm3, %v2058_v44  ;;  %v301_v15 = vld [vmem:[#allocation2 + $0xa] sm:$0x3f]  ;;  %502 = vst.msk [vmem:[#allocation2 + $0x8] sm:$0x1] %vm242_vm3, %v2058_v44 }
 0x175   :  { %552 = vst.msk [vmem:[#allocation2 + $0xf] sm:$0x1] %vm242_vm3, %v2058_v44  ;;  %v299_v16 = vld [vmem:[#allocation2 + $0x9] sm:$0x3f] }
 0x177   :  { %306 = vrot.lane.b32.xlu0 %v299_v16, %s2059_s24 }
 0x178   :  { %314 = vrot.lane.b32.xlu1 %v301_v15, %s2055_s14 }
 0x1e5   :  { %v305_v18 = vpop.permute.xlu0 %304 }
 0x1e6   :  { %v313_v17 = vpop.permute.xlu1 %312  ;;  %v319_v20 = vsel %vm318_vm5, %v296_v11, %v305_v18 }
 0x1e7   :  { %v321_v21 = vsel %vm51_vm0, %v319_v20, %v313_v17 }
 0x1e8   :  { %v325_v22 = vcombine.high %v321_v21, %v321_v21  ;;  %v332_v24 = vrot.slane %v321_v21, %v2134_v23 }
 0x1e9   :  { %v307_v26 = vpop.permute.xlu0 %306 }
 0x1ea   :  { %v315_v25 = vpop.permute.xlu1 %314  ;;  %v340_v27 = vcombine.high %v332_v24, %v332_v24  ;;  %v320_v28 = vsel %vm318_vm5, %v297_v14, %v307_v26  ;;  %v339_v30 = vrot.slane %v325_v22, %v2134_v23 }
 0x1eb   :  { %v322_v29 = vsel %vm51_vm0, %v320_v28, %v315_v25 }
 0x1ec   :  { %v341_v31 = vcombine.high %v322_v29, %v322_v29  ;;  %v348_v32 = vrot.slane %v322_v29, %v2134_v23  ;;  %v363_v33 = vcombine.low %v332_v24, %v340_v27 }
 0x1ee   :  { %v355_v34 = vrot.slane %v341_v31, %v2134_v23  ;;  %v356_v35 = vcombine.high %v348_v32, %v348_v32  ;;  %v364_v36 = vcombine.low %v339_v30, %v348_v32  ;;  %v371_v38 = vrot.slane %v363_v33, %v2134_v23 }
 0x1f0   :  { %v380_v37 = vcombine.low %v356_v35, %v355_v34  ;;  %v378_v39 = vrot.slane %v364_v36, %v2134_v23 }
 0x1f2   :  { %v379_v40 = vcombine.low %v371_v38, %v378_v39  ;;  %v387_v41 = vrot.slane %v380_v37, %v2134_v23 }
 0x1f4   :  { %1937 = vmatprep.mubr.msk.f32.mxu1 %vm388_vm6, %v379_v40 }
 0x1f5   :  { %1938 = vmatmul.mubr.msk.f32.vlgmr.msra.gmra.mrb[0].mxu1 %vm388_vm6, %v387_v41 }
 0x1f6   :  { %2009 = vmatpush3.bf16.msra.mxu1 %v2170_v9 }
 0x1f7   :  { %1944 = vmatprep.subr.mxu1 %v2177_v10 }
 0x1fa   :  { %1945 = vmatpush3.msra.mxu1 %v2177_v10 }
 0x2c8   :  { %v1939_v43 = vpop.f32.mrb[0].mxu1 }
 0x2c9   :  { %v465_v45 = vadd.f32 %v1939_v43, %v2213_v42  ;;  %v459_v46 = vpop.f32.mrb[1].mxu1 }
 0x2ca   :  { %v460_v47 = vadd.f32 %v2213_v42, %v459_v46 }
 0x2cb   :  { %v493_v48 = vrot.slane %v465_v45, %v2134_v23 }
 0x2cc   :  { %v470_v49 = vcombine.high %v460_v47, %v460_v47  ;;  %v477_v50 = vrot.slane %v460_v47, %v2134_v23 }
 0x2cd   :  { %v494_v51 = vcombine.high %v493_v48, %v493_v48  ;;  %v507_v58 = vmax.f32 %v493_v48, 0.0 }
 0x2ce   :  { %v484_v52 = vrot.slane %v470_v49, %v2134_v23  ;;  %v485_v53 = vcombine.high %v477_v50, %v477_v50  ;;  %v503_v55 = vmax.f32 %v477_v50, 0.0 }
 0x2cf   :  { %v508_v59 = vmax.f32 %v494_v51, 0.0 }
 0x2d0   :  { %v486_v54 = vcombine.high %v484_v52, %v484_v52  ;;  %v504_v56 = vmax.f32 %v485_v53, 0.0  ;;  %v505_v57 = vmax.f32 %v484_v52, 0.0 }
 0x2d1   :  { %v545_v1 = vrot.slane %v508_v59, %v2134_v23 }
 0x2d2   :  { %v506_v60 = vmax.f32 %v486_v54, 0.0  ;;  %v515_v61 = vcombine.low %v503_v55, %v504_v56  ;;  %v529_v63 = vrot.slane %v505_v57, %v2134_v23 }
 0x2d4   :  { %v522_v62 = vrot.slane %v515_v61, %v2134_v23  ;;  %v531_v0 = vcombine.low %v506_v60, %v507_v58 }
 0x2d6   :  { %v530_v2 = vcombine.low %v522_v62, %v529_v63  ;;  %v538_v3 = vrot.slane %v531_v0, %v2134_v23 }
 0x2d8   :  { %v546_v4 = vcombine.low %v538_v3, %v545_v1  ;;  %549 = vst.msk [vmem:[#allocation2 + $0x1] sm:$0x3f] %vm291_vm4, %v530_v2 }
 0x2da   :  { %550 = vst.msk [vmem:[#allocation2 + $0x9] sm:$0x3f] %vm291_vm4, %v546_v4 }
 0x2df   :  { %v555_v5 = vld [vmem:[#allocation2 + $0x1] sm:$0x3f] }
 0x2e0   :  { %v557_v6 = vld [vmem:[#allocation2 + $0x2] sm:$0x3f]  ;;  %561 = vrot.lane.b32.xlu0 %v555_v5, %s2059_s24 }
 0x2e1   :  { %569 = vrot.lane.b32.xlu1 %v557_v6, %s2055_s14  ;;  %780 = vst.msk [vmem:[#allocation2 + $0x6] sm:$0x1] %vm242_vm3, %v2058_v44  ;;  %v558_v7 = vld [vmem:[#allocation2 + $0xa] sm:$0x3f]  ;;  %v553_v11 = vld [vmem:[#allocation2] sm:$0x3f] }
 0x2e2   :  { %v556_v8 = vld [vmem:[#allocation2 + $0x9] sm:$0x3f] }
 0x2e3   :  { %781 = vst.msk [vmem:[#allocation2 + $0xe] sm:$0x1] %vm242_vm3, %v2058_v44  ;;  %v554_v18 = vld [vmem:[#allocation2 + $0x8] sm:$0x3f] }
 0x2e4   :  { %563 = vrot.lane.b32.xlu0 %v556_v8, %s2059_s24 }
 0x2e5   :  { %571 = vrot.lane.b32.xlu1 %v558_v7, %s2055_s14 }
 0x352   :  { %v562_v13 = vpop.permute.xlu0 %561 }
 0x353   :  { %v570_v12 = vpop.permute.xlu1 %569  ;;  %v575_v14 = vsel %vm318_vm5, %v553_v11, %v562_v13 }
 0x354   :  { %v577_v15 = vsel %vm51_vm0, %v575_v14, %v570_v12  ;;  %v2060_v14 = vmov 0.0|0.0  }
 0x355   :  { %v581_v16 = vcombine.high %v577_v15, %v577_v15  ;;  %v588_v17 = vrot.slane %v577_v15, %v2134_v23  ;;  %2010 = vmatprep.subr.bf16.mxu0 %v2060_v14  ;;  %2013 = vmatprep.subr.bf16.mxu1 %v2060_v14  ;;  %v2062_v15 = vmov 1966171168  }
 0x356   :  { %v564_v21 = vpop.permute.xlu0 %563  ;;  %2012 = vmatpush3.bf16.msra.mxu0 %v2170_v9 }
 0x357   :  { %v572_v20 = vpop.permute.xlu1 %571  ;;  %v596_v22 = vcombine.high %v588_v17, %v588_v17  ;;  %v576_v24 = vsel %vm318_vm5, %v554_v18, %v564_v21  ;;  %v595_v26 = vrot.slane %v581_v16, %v2134_v23  ;;  %1953 = vmatprep.subr.mxu0 %v2058_v44  ;;  %v835_v16 = vunpack.c.l.s4 %v2062_v15 }
 0x358   :  { %v578_v25 = vsel %vm51_vm0, %v576_v24, %v572_v20 }
 0x359   :  { %v613_v27 = vcombine.low %v588_v17, %v596_v22  ;;  %v597_v28 = vcombine.high %v578_v25, %v578_v25  ;;  %v604_v29 = vrot.slane %v578_v25, %v2134_v23  ;;  %v836_v17 = vunpack.c.0.s8 %v835_v16 }
 0x35a   :  { %1954 = vmatpush3.msra.mxu0 %v2177_v10 }
 0x35b   :  { %v611_v30 = vrot.slane %v597_v28, %v2134_v23  ;;  %v612_v31 = vcombine.high %v604_v29, %v604_v29  ;;  %v614_v32 = vcombine.low %v595_v26, %v604_v29  ;;  %v621_v33 = vrot.slane %v613_v27, %v2134_v23  ;;  %2016 = vmatprep.subr.bf16.mxu0 %v2060_v14 }
 0x35c   :  { %v2297_v21 = vsub.s32 %v836_v17, %v2130_v19 }
 0x35d   :  { %v628_v34 = vrot.slane %v614_v32, %v2134_v23  ;;  %v630_v35 = vcombine.low %v612_v31, %v611_v30 }
 0x35f   :  { %v637_v36 = vrot.slane %v630_v35, %v2134_v23  ;;  %v629_v37 = vcombine.low %v621_v33, %v628_v34 }
 0x361   :  { %1946 = vmatprep.mubr.msk.f32.mxu1 %vm388_vm6, %v629_v37 }
 0x362   :  { %1947 = vmatmul.mubr.msk.f32.vlgmr.msra.gmra.mrb[2].mxu1 %vm388_vm6, %v637_v36 }
 0x363   :  { %2015 = vmatpush3.bf16.msra.mxu1 %v2170_v9  ;;  %1964 = vmatprep.mubr.msk.f32.mxu1 %vm2061_vm8, %v2058_v44 }
 0x364   :  { %1962 = vmatprep.subr.mxu1 %v2058_v44 }
 0x367   :  { %1963 = vmatpush3.msra.mxu1 %v2177_v10 }
 0x368   :  { %2019 = vmatprep.subr.bf16.mxu1 %v2060_v14 }
 0x435   :  { %v1948_v38 = vpop.f32.mrb[2].mxu1 }
 0x436   :  { %v714_v39 = vadd.f32 %v1948_v38, %v2213_v42  ;;  %v708_v40 = vpop.f32.mrb[3].mxu1 }
 0x437   :  { %v709_v41 = vadd.f32 %v2213_v42, %v708_v40 }
 0x438   :  { %v742_v43 = vrot.slane %v714_v39, %v2134_v23 }
 0x439   :  { %v719_v45 = vcombine.high %v709_v41, %v709_v41  ;;  %v726_v46 = vrot.slane %v709_v41, %v2134_v23 }
 0x43a   :  { %v743_v49 = vcombine.high %v742_v43, %v742_v43 }
 0x43b   :  { %v733_v47 = vrot.slane %v719_v45, %v2134_v23  ;;  %v734_v48 = vcombine.high %v726_v46, %v726_v46 }
 0x43c   :  { %v774_v55 = vrot.slane %v743_v49, %v2134_v23 }
 0x43d   :  { %v735_v50 = vcombine.high %v733_v47, %v733_v47  ;;  %v744_v51 = vcombine.low %v726_v46, %v734_v48  ;;  %v758_v53 = vrot.slane %v733_v47, %v2134_v23 }
 0x43f   :  { %v751_v52 = vrot.slane %v744_v51, %v2134_v23  ;;  %v760_v54 = vcombine.low %v735_v50, %v742_v43 }
 0x441   :  { %v759_v56 = vcombine.low %v751_v52, %v758_v53  ;;  %v767_v57 = vrot.slane %v760_v54, %v2134_v23 }
 0x443   :  { %v775_v58 = vcombine.low %v767_v57, %v774_v55  ;;  %778 = vst.msk [vmem:[#allocation2] sm:$0x3f] %vm291_vm4, %v759_v56 }
 0x445   :  { %779 = vst.msk [vmem:[#allocation2 + $0x8] sm:$0x3f] %vm291_vm4, %v775_v58 }
 0x44a   :  { %v782_v59 = vld [vmem:[#allocation2] ss:$2 sm:$0x7]  ;;  %v786_v60 = vld [vmem:[#allocation2 + $0x1] ss:$2 sm:$0x7] }
 0x44b   :  { %v790_v61 = vld [vmem:[#allocation2 + $0x2] ss:$2 sm:$0x7]  ;;  %v793_v62 = vmax.f32 %v782_v59, %v786_v60  ;;  %797 = vst.msk [vmem:[#allocation2] sm:$0x1] %vm242_vm3, %v2058_v44 }
 0x44c   :  { %804 = vst.msk [vmem:[#allocation2 + $0x4] sm:$0x1] %vm242_vm3, %v2058_v44  ;;  %v784_v63 = vld [vmem:[#allocation2 + $0x8] ss:$2 sm:$0x7] }
 0x44d   :  { %v788_v0 = vld [vmem:[#allocation2 + $0x9] ss:$2 sm:$0x7]  ;;  %v2262_v1 = vmax.f32 %v793_v62, %v790_v61  ;;  %v792_v23 = vld [vmem:[#allocation2 + $0xa] ss:$2 sm:$0x7] }
 0x44e   :  { %v794_v2 = vmax.f32 %v784_v63, %v788_v0  ;;  %798 = vst.msk [vmem:[#allocation2 + $0x8] sm:$0x1] %vm242_vm3, %v2058_v44  ;;  %805 = vst.msk [vmem:[#allocation2 + $0xc] sm:$0x1] %vm242_vm3, %v2058_v44 }
 0x44f   :  { %v799_v3 = vmax.f32 %v2262_v1, 0.0 }
 0x450   :  { %v2269_v4 = vmax.f32 %v794_v2, %v792_v23 }
 0x451   :  { %802 = vst.msk [vmem:[#allocation2 + $0x1] sm:$0x7] %vm801_vm7, %v799_v3 }
 0x452   :  { %v800_v5 = vmax.f32 %v2269_v4, 0.0 }
 0x454   :  { %803 = vst.msk [vmem:[#allocation2 + $0x9] sm:$0x7] %vm801_vm7, %v800_v5 }
 0x458   :  { %v810_v6 = vld [vmem:[#allocation2 + $0x2] sm:$0x7] }
 0x459   :  { %v808_v7 = vld [vmem:[#allocation2 + $0x1] sm:$0x7]  ;;  %822 = vrot.lane.b32.xlu1 %v810_v6, %s2055_s14  ;;  %1110 = vst.msk [vmem:[#allocation2 + $0x4] sm:$0x1] %vm242_vm3, %v2058_v44 }
 0x45a   :  { %v806_v8 = vld [vmem:[#allocation2] sm:$0x7]  ;;  %814 = vrot.lane.b32.xlu0 %v808_v7, %s2059_s24 }
 0x45b   :  { %1046 = vst.msk [vmem:[#allocation2] sm:$0x1] %vm242_vm3, %v2058_v44  ;;  %v811_v11 = vld [vmem:[#allocation2 + $0xa] sm:$0x7] }
 0x45c   :  { %v807_v12 = vld [vmem:[#allocation2 + $0x8] sm:$0x7]  ;;  %1111 = vst.msk [vmem:[#allocation2 + $0xc] sm:$0x1] %vm242_vm3, %v2058_v44 }
 0x45d   :  { %1047 = vst.msk [vmem:[#allocation2 + $0x8] sm:$0x1] %vm242_vm3, %v2058_v44  ;;  %v809_v13 = vld [vmem:[#allocation2 + $0x9] sm:$0x7]  ;;  %824 = vrot.lane.b32.xlu1 %v811_v11, %s2055_s14 }
 0x45e   :  { %816 = vrot.lane.b32.xlu0 %v809_v13, %s2059_s24 }
 0x4cb   :  { %v823_v18 = vpop.permute.xlu1 %822 }
 0x4cc   :  { %v815_v20 = vpop.permute.xlu0 %814 }
 0x4cd   :  { %v828_v22 = vsel %vm318_vm5, %v806_v8, %v815_v20 }
 0x4ce   :  { %v830_v24 = vsel %vm51_vm0, %v828_v22, %v823_v18 }
 0x4cf   :  { %v840_v25 = vrot.slane %v830_v24, %v2297_v21  ;;  %v825_v26 = vpop.permute.xlu1 %824 }
 0x4d0   :  { %v817_v27 = vpop.permute.xlu0 %816 }
 0x4d1   :  { %v841_v28 = vcombine.high %v840_v25, %v840_v25  ;;  %v848_v29 = vrot.slane %v840_v25, %v2297_v21  ;;  %v829_v30 = vsel %vm318_vm5, %v807_v12, %v817_v27 }
 0x4d2   :  { %v831_v31 = vsel %vm51_vm0, %v829_v30, %v825_v26 }
 0x4d3   :  { %v855_v32 = vrot.slane %v841_v28, %v2297_v21  ;;  %v863_v19 = vrot.slane %v831_v31, %v2297_v21  ;;  %v856_v33 = vcombine.high %v848_v29, %v848_v29 }
 0x4d5   :  { %v880_v34 = vcombine.low %v848_v29, %v855_v32  ;;  %v864_v35 = vcombine.high %v863_v19, %v863_v19  ;;  %v871_v36 = vrot.slane %v863_v19, %v2297_v21 }
 0x4d7   :  { %v878_v37 = vrot.slane %v864_v35, %v2297_v21  ;;  %v879_v38 = vcombine.high %v871_v36, %v871_v36  ;;  %v881_v39 = vcombine.low %v856_v33, %v871_v36  ;;  %v889_v40 = vrot.slane %v880_v34, %v2297_v21 }
 0x4d9   :  { %v882_v41 = vcombine.low %v878_v37, %v879_v38  ;;  %v896_v43 = vrot.slane %v881_v39, %v2297_v21 }
 0x4db   :  { %v903_v45 = vrot.slane %v882_v41, %v2297_v21  ;;  %v904_v46 = vcombine.low %v889_v40, %v896_v43 }
 0x4dd   :  { %v911_v47 = vrot.slane %v904_v46, %v2297_v21  ;;  %v918_v48 = vrot.slane %v903_v45, %v2297_v21 }
 0x4df   :  { %v919_v49 = vcombine.low %v911_v47, %v918_v48 }
 0x4e1   :  { %1956 = vmatmul.mubr.msk.f32.vlgmr.msra.gmra.mrb[2].mxu0 %vm388_vm6, %v919_v49 }
 0x4e2   :  { %2018 = vmatpush3.bf16.msra.mxu0 %v2170_v9  ;;  %1973 = vmatprep.mubr.msk.f32.mxu0 %vm2061_vm8, %v2058_v44 }
 0x4e3   :  { %1971 = vmatprep.subr.mxu0 %v2058_v44 }
 0x4e6   :  { %1972 = vmatpush3.msra.mxu0 %v2177_v10 }
 0x4e7   :  { %1985 = vmatprep.subr.mxu0 %v2058_v44 }
 0x5b4   :  { %v988_v50 = vpop.f32.mrb[2].mxu0 }
 0x5b5   :  { %v989_v51 = vadd.f32 %v2213_v42, %v988_v50  ;;  %v1957_v52 = vpop.f32.mrb[3].mxu0 }
 0x5b7   :  { %v993_v53 = vcombine.high %v989_v51, %v989_v51  ;;  %v1000_v54 = vrot.slane %v989_v51, %v2297_v21 }
 0x5b9   :  { %v1007_v55 = vrot.slane %v993_v53, %v2297_v21  ;;  %v1008_v56 = vcombine.high %v1000_v54, %v1000_v54  ;;  %v1016_v57 = vrot.slane %v1000_v54, %v2297_v21 }
 0x5bb   :  { %v1009_v58 = vcombine.high %v1007_v55, %v1007_v55  ;;  %v1023_v59 = vrot.slane %v1007_v55, %v2297_v21  ;;  %v1030_v60 = vrot.slane %v1008_v56, %v2297_v21  ;;  %v1038_v61 = vcombine.high %v1016_v57, %v1016_v57 }
 0x5bc   :  { %v1048_v62 = vmax.f32 %v1016_v57, 0.0  ;;  %v1360_v57 = vrot.slane %v2262_v1, %v2297_v21 }
 0x5bd   :  { %v1037_v63 = vrot.slane %v1009_v58, %v2297_v21  ;;  %v1039_v0 = vcombine.high %v1030_v60, %v1030_v60  ;;  %v1049_v23 = vmax.f32 %v1030_v60, 0.0  ;;  %v1050_v2 = vmax.f32 %v1038_v61, 0.0 }
 0x5be   :  { %v1052_v5 = vmax.f32 %v1023_v59, 0.0  ;;  %v1383_v59 = vrot.slane %v2269_v4, %v2297_v21 }
 0x5bf   :  { %v1051_v3 = vmax.f32 %v1039_v0, 0.0  ;;  %v1053_v6 = vmax.f32 %v1037_v63, 0.0  ;;  %v1060_v7 = vcombine.low %v1048_v62, %v1049_v23  ;;  %v1074_v11 = vrot.slane %v1050_v2, %v2297_v21 }
 0x5c0   :  { %v1361_v62 = vcombine.high %v1360_v57, %v1360_v57  ;;  %v1384_v23 = vcombine.high %v1383_v59, %v1383_v59  ;;  %v1391_v2 = vrot.slane %v1383_v59, %v2297_v21 }
 0x5c1   :  { %v1067_v8 = vrot.slane %v1060_v7, %v2297_v21  ;;  %v1083_v12 = vcombine.low %v1051_v3, %v1052_v5  ;;  %v1097_v15 = vrot.slane %v1053_v6, %v2297_v21 }
 0x5c2   :  { %v1375_v5 = vrot.slane %v1361_v62, %v2297_v21 }
 0x5c3   :  { %v1075_v13 = vcombine.low %v1067_v8, %v1074_v11  ;;  %v1090_v14 = vrot.slane %v1083_v12, %v2297_v21  ;;  %v1398_v12 = vrot.slane %v1384_v23, %v2297_v21 }
 0x5c5   :  { %v1082_v16 = vrot.slane %v1075_v13, %v2297_v21  ;;  %v1098_v17 = vcombine.low %v1090_v14, %v1097_v15  ;;  %v1399_v13 = vcombine.high %v1391_v2, %v1391_v2 }
 0x5c7   :  { %v1105_v18 = vrot.slane %v1098_v17, %v2297_v21  ;;  %1108 = vst.msk [vmem:[#allocation2 + $0x1] sm:$0x7] %vm801_vm7, %v1082_v16 }
 0x5c9   :  { %1109 = vst.msk [vmem:[#allocation2 + $0x9] sm:$0x7] %vm801_vm7, %v1105_v18 }
 0x5ce   :  { %v1116_v20 = vld [vmem:[#allocation2 + $0x2] sm:$0x7] }
 0x5cf   :  { %v1114_v22 = vld [vmem:[#allocation2 + $0x1] sm:$0x7]  ;;  %1128 = vrot.lane.b32.xlu1 %v1116_v20, %s2055_s14 }
 0x5d0   :  { %1120 = vrot.lane.b32.xlu0 %v1114_v22, %s2059_s24  ;;  %1468 = vst.msk [vmem:[#allocation2 + $0x3] sm:$0x1] %vm242_vm3, %v2058_v44  ;;  %v1117_v24 = vld [vmem:[#allocation2 + $0xa] sm:$0x7]  ;;  %v1112_v28 = vld [vmem:[#allocation2] sm:$0x7] }
 0x5d1   :  { %v1115_v25 = vld [vmem:[#allocation2 + $0x9] sm:$0x7] }
 0x5d2   :  { %1469 = vst.msk [vmem:[#allocation2 + $0xb] sm:$0x1] %vm242_vm3, %v2058_v44  ;;  %v1113_v33 = vld [vmem:[#allocation2 + $0x8] sm:$0x7] }
 0x5d3   :  { %1130 = vrot.lane.b32.xlu1 %v1117_v24, %s2055_s14 }
 0x5d4   :  { %1122 = vrot.lane.b32.xlu0 %v1115_v25, %s2059_s24 }
 0x641   :  { %v1129_v26 = vpop.permute.xlu1 %1128 }
 0x642   :  { %v1121_v27 = vpop.permute.xlu0 %1120 }
 0x643   :  { %v1134_v29 = vsel %vm318_vm5, %v1112_v28, %v1121_v27 }
 0x644   :  { %v1136_v30 = vsel %vm51_vm0, %v1134_v29, %v1129_v26 }
 0x645   :  { %v1146_v31 = vrot.slane %v1136_v30, %v2297_v21  ;;  %v1131_v32 = vpop.permute.xlu1 %1130 }
 0x646   :  { %v1123_v19 = vpop.permute.xlu0 %1122 }
 0x647   :  { %v1147_v34 = vcombine.high %v1146_v31, %v1146_v31  ;;  %v1154_v35 = vrot.slane %v1146_v31, %v2297_v21  ;;  %v1135_v36 = vsel %vm318_vm5, %v1113_v33, %v1123_v19 }
 0x648   :  { %v1137_v37 = vsel %vm51_vm0, %v1135_v36, %v1131_v32 }
 0x649   :  { %v1161_v38 = vrot.slane %v1147_v34, %v2297_v21  ;;  %v1169_v39 = vrot.slane %v1137_v37, %v2297_v21  ;;  %v1162_v40 = vcombine.high %v1154_v35, %v1154_v35 }
 0x64b   :  { %v1186_v41 = vcombine.low %v1154_v35, %v1161_v38  ;;  %v1170_v43 = vcombine.high %v1169_v39, %v1169_v39  ;;  %v1177_v45 = vrot.slane %v1169_v39, %v2297_v21 }
 0x64d   :  { %v1184_v46 = vrot.slane %v1170_v43, %v2297_v21  ;;  %v1185_v47 = vcombine.high %v1177_v45, %v1177_v45  ;;  %v1187_v48 = vcombine.low %v1162_v40, %v1177_v45  ;;  %v1195_v49 = vrot.slane %v1186_v41, %v2297_v21 }
 0x64f   :  { %v1188_v50 = vcombine.low %v1184_v46, %v1185_v47  ;;  %v1202_v51 = vrot.slane %v1187_v48, %v2297_v21 }
 0x651   :  { %v1209_v52 = vrot.slane %v1188_v50, %v2297_v21  ;;  %v1210_v53 = vcombine.low %v1195_v49, %v1202_v51 }
 0x653   :  { %v1217_v54 = vrot.slane %v1210_v53, %v2297_v21  ;;  %v1224_v55 = vrot.slane %v1209_v52, %v2297_v21 }
 0x655   :  { %v1225_v56 = vcombine.low %v1217_v54, %v1224_v55 }
 0x657   :  { %1965 = vmatmul.mubr.msk.f32.vlgmr.msra.gmra.mrb[4].mxu1 %vm388_vm6, %v1225_v56 }
 0x658   :  { %2021 = vmatpush3.bf16.msra.mxu1 %v2170_v9  ;;  %1982 = vmatprep.mubr.msk.f32.mxu1 %vm2061_vm8, %v2058_v44  ;;  %v1368_v9 = vrot.slane %v1360_v57, %v2297_v21 }
 0x659   :  { %1980 = vmatprep.subr.mxu1 %v2058_v44 }
 0x65a   :  { %v1376_v4 = vcombine.high %v1368_v9, %v1368_v9 }
 0x65c   :  { %1981 = vmatpush3.msra.mxu1 %v2177_v10 }
 0x72a   :  { %v1294_v58 = vpop.f32.mrb[4].mxu1 }
 0x72b   :  { %v1295_v60 = vadd.f32 %v2213_v42, %v1294_v58  ;;  %v1966_v61 = vpop.f32.mrb[5].mxu1 }
 0x72d   :  { %v1299_v63 = vcombine.high %v1295_v60, %v1295_v60  ;;  %v1306_v0 = vrot.slane %v1295_v60, %v2297_v21 }
 0x72f   :  { %v1313_v10 = vrot.slane %v1299_v63, %v2297_v21  ;;  %v1314_v3 = vcombine.high %v1306_v0, %v1306_v0  ;;  %v1322_v1 = vrot.slane %v1306_v0, %v2297_v21 }
 0x731   :  { %v1315_v6 = vcombine.high %v1313_v10, %v1313_v10  ;;  %v1329_v7 = vrot.slane %v1313_v10, %v2297_v21  ;;  %v1336_v8 = vrot.slane %v1314_v3, %v2297_v21  ;;  %v1344_v11 = vcombine.high %v1322_v1, %v1322_v1 }
 0x732   :  { %v1406_v14 = vadd.f32 %v1368_v9, %v1322_v1 }
 0x733   :  { %v1343_v15 = vrot.slane %v1315_v6, %v2297_v21  ;;  %v1345_v16 = vcombine.high %v1336_v8, %v1336_v8  ;;  %v1407_v17 = vadd.f32 %v1375_v5, %v1336_v8  ;;  %v1408_v18 = vadd.f32 %v1376_v4, %v1344_v11 }
 0x734   :  { %v1410_v20 = vadd.f32 %v1398_v12, %v1329_v7 }
 0x735   :  { %v1409_v22 = vadd.f32 %v1391_v2, %v1345_v16  ;;  %v1411_v24 = vadd.f32 %v1399_v13, %v1343_v15  ;;  %v1418_v25 = vcombine.low %v1406_v14, %v1407_v17  ;;  %v1432_v27 = vrot.slane %v1408_v18, %v2297_v21 }
 0x737   :  { %v1425_v26 = vrot.slane %v1418_v25, %v2297_v21  ;;  %v1441_v28 = vcombine.low %v1409_v22, %v1410_v20  ;;  %v1455_v31 = vrot.slane %v1411_v24, %v2297_v21 }
 0x739   :  { %v1433_v29 = vcombine.low %v1425_v26, %v1432_v27  ;;  %v1448_v30 = vrot.slane %v1441_v28, %v2297_v21  ;;  %v1753_v26 = vld [vmem:[%s2472_s5] sm:$0xff] }
 0x73b   :  { %v1440_v32 = vrot.slane %v1433_v29, %v2297_v21  ;;  %v1456_v19 = vcombine.low %v1448_v30, %v1455_v31 }
 0x73d   :  { %v1463_v33 = vrot.slane %v1456_v19, %v2297_v21  ;;  %1466 = vst.msk [vmem:[#allocation2] sm:$0x7] %vm801_vm7, %v1440_v32 }
 0x73f   :  { %1467 = vst.msk [vmem:[#allocation2 + $0x8] sm:$0x7] %vm801_vm7, %v1463_v33 }
 0x744   :  { %v1470_v34 = vld [vmem:[#allocation2] ss:$2 sm:$0x1]  ;;  %v1472_v35 = vld [vmem:[#allocation2 + $0x1] ss:$2 sm:$0x1] }
 0x745   :  { %v1474_v36 = vld [vmem:[#allocation2 + $0x2] ss:$2 sm:$0x1]  ;;  %v1476_v37 = vmax.f32 %v1470_v34, %v1472_v35  ;;  %1480 = vst.msk [vmem:[#allocation2] sm:$0x1] %vm242_vm3, %v2058_v44 }
 0x746   :  { %v1471_v38 = vld [vmem:[#allocation2 + $0x8] ss:$2 sm:$0x1]  ;;  %v1473_v39 = vld [vmem:[#allocation2 + $0x9] ss:$2 sm:$0x1] }
 0x747   :  { %1486 = vst.msk [vmem:[#allocation2 + $0x2] sm:$0x1] %vm242_vm3, %v2058_v44  ;;  %v1475_v40 = vld [vmem:[#allocation2 + $0xa] ss:$2 sm:$0x1]  ;;  %v1477_v41 = vmax.f32 %v1471_v38, %v1473_v39  ;;  %v2394_v43 = vmax.f32 %v1476_v37, %v1474_v36 }
 0x748   :  { %1481 = vst.msk [vmem:[#allocation2 + $0x8] sm:$0x1] %vm242_vm3, %v2058_v44  ;;  %1487 = vst.msk [vmem:[#allocation2 + $0xa] sm:$0x1] %vm242_vm3, %v2058_v44 }
 0x749   :  { %v2398_v45 = vmax.f32 %v1477_v41, %v1475_v40  ;;  %v1482_v46 = vmax.f32 %v2394_v43, 0.0 }
 0x74b   :  { %v1483_v47 = vmax.f32 %v2398_v45, 0.0  ;;  %1484 = vst.msk [vmem:[#allocation2 + $0x1] sm:$0x1] %vm242_vm3, %v1482_v46 }
 0x74c   :  { %v1488_v48 = vld [vmem:[#allocation2] sm:$0x1] }
 0x74d   :  { %1485 = vst.msk [vmem:[#allocation2 + $0x9] sm:$0x1] %vm242_vm3, %v1483_v47  ;;  %1616 = vst.msk [vmem:[#allocation2] sm:$0x1] %vm242_vm3, %v2058_v44 }
 0x74e   :  { %v1492_v49 = vld [vmem:[#allocation2 + $0x2] sm:$0x1] }
 0x74f   :  { %1622 = vst.msk [vmem:[#allocation2 + $0x2] sm:$0x1] %vm242_vm3, %v2058_v44  ;;  %v1489_v50 = vld [vmem:[#allocation2 + $0x8] sm:$0x1]  ;;  %v1493_v51 = vld [vmem:[#allocation2 + $0xa] sm:$0x1] }
 0x750   :  { %1617 = vst.msk [vmem:[#allocation2 + $0x8] sm:$0x1] %vm242_vm3, %v2058_v44  ;;  %1506 = vrot.lane.b32.xlu1 %v1493_v51, %s2055_s14  ;;  %1623 = vst.msk [vmem:[#allocation2 + $0xa] sm:$0x1] %vm242_vm3, %v2058_v44 }
 0x752   :  { %v1490_v53 = vld [vmem:[#allocation2 + $0x1] sm:$0x1] }
 0x754   :  { %v1491_v52 = vld [vmem:[#allocation2 + $0x9] sm:$0x1]  ;;  %1504 = vrot.lane.b32.xlu1 %v1492_v49, %s2055_s14  ;;  %v1624_v16 = vld [vmem:[#allocation2] sm:$0x1] }
 0x755   :  { %1498 = vrot.lane.b32.xlu0 %v1491_v52, %s2059_s24 }
 0x756   :  { %v1628_v0 = vld [vmem:[#allocation2 + $0x2] sm:$0x1] }
 0x757   :  { %v1629_v63 = vld [vmem:[#allocation2 + $0xa] sm:$0x1]  ;;  %v1625_v12 = vld [vmem:[#allocation2 + $0x8] sm:$0x1] }
 0x758   :  { %1642 = vrot.lane.b32.xlu1 %v1629_v63, %s2055_s14 }
 0x759   :  { %1496 = vrot.lane.b32.xlu0 %v1490_v53, %s2059_s24 }
 0x75c   :  { %1640 = vrot.lane.b32.xlu1 %v1628_v0, %s2055_s14 }
 0x7c2   :  { %v1507_v54 = vpop.permute.xlu1 %1506 }
 0x7c6   :  { %v1505_v58 = vpop.permute.xlu1 %1504 }
 0x7c7   :  { %v1499_v55 = vpop.permute.xlu0 %1498 }
 0x7c8   :  { %v1511_v56 = vsel %vm318_vm5, %v1489_v50, %v1499_v55 }
 0x7c9   :  { %v1513_v57 = vsel %vm51_vm0, %v1511_v56, %v1507_v54 }
 0x7ca   :  { %v1516_v60 = vrot.slane %v1513_v57, 7  ;;  %v1643_v11 = vpop.permute.xlu1 %1642 }
 0x7cb   :  { %v1497_v59 = vpop.permute.xlu0 %1496 }
 0x7cc   :  { %v1510_v61 = vsel %vm318_vm5, %v1488_v48, %v1497_v59 }
 0x7cd   :  { %v1512_v62 = vsel %vm51_vm0, %v1510_v61, %v1505_v58 }
 0x7ce   :  { %v1518_v9 = vsel %vm1517_vm9, %v1516_v60, %v1512_v62  ;;  %v1641_v17 = vpop.permute.xlu1 %1640 }
 0x7cf   :  { %1974 = vmatmul.mubr.msk.f32.vlgmr.msra.gmra.mrb[4].mxu0 %vm388_vm6, %v1518_v9 }
 0x7d0   :  { %1987 = vmatprep.mubr.msk.f32.mxu0 %vm2061_vm8, %v2058_v44  ;;  %1986 = vmatpush3.msra.mxu0 %v1753_v26 }
 0x8a2   :  { %v1587_v23 = vpop.f32.mrb[4].mxu0 }
 0x8a3   :  { %v1588_v2 = vadd.f32 %v2213_v42, %v1587_v23  ;;  %v1975_v10 = vpop.f32.mrb[5].mxu0 }
 0x8a5   :  { %v1598_v3 = vrot.slane %v1588_v2, %v2297_v21 }
 0x8a7   :  { %v1599_v1 = vcombine.high %v1598_v3, %v1598_v3  ;;  %v1606_v5 = vrot.slane %v1598_v3, %v2297_v21 }
 0x8a9   :  { %v1613_v4 = vrot.slane %v1599_v1, %v2297_v21  ;;  %v1618_v6 = vmax.f32 %v1606_v5, 0.0 }
 0x8ab   :  { %v1619_v7 = vmax.f32 %v1613_v4, 0.0  ;;  %1620 = vst.msk [vmem:[#allocation2 + $0x1] sm:$0x1] %vm242_vm3, %v1618_v6 }
 0x8ad   :  { %1621 = vst.msk [vmem:[#allocation2 + $0x9] sm:$0x1] %vm242_vm3, %v1619_v7 }
 0x8b2   :  { %v1626_v8 = vld [vmem:[#allocation2 + $0x1] sm:$0x1] }
 0x8b4   :  { %v1627_v44 = vld [vmem:[#allocation2 + $0x9] sm:$0x1] }
 0x8b5   :  { %1634 = vrot.lane.b32.xlu0 %v1627_v44, %s2059_s24 }
 0x8b9   :  { %1632 = vrot.lane.b32.xlu0 %v1626_v8, %s2059_s24 }
 0x927   :  { %v1635_v13 = vpop.permute.xlu0 %1634 }
 0x928   :  { %v1647_v14 = vsel %vm318_vm5, %v1625_v12, %v1635_v13 }
 0x929   :  { %v1649_v15 = vsel %vm51_vm0, %v1647_v14, %v1643_v11 }
 0x92a   :  { %v1652_v20 = vrot.slane %v1649_v15, 7 }
 0x92b   :  { %v1633_v18 = vpop.permute.xlu0 %1632 }
 0x92c   :  { %v1646_v22 = vsel %vm318_vm5, %v1624_v16, %v1633_v18 }
 0x92d   :  { %v1648_v24 = vsel %vm51_vm0, %v1646_v22, %v1641_v17 }
 0x92e   :  { %v1653_v25 = vsel %vm1517_vm9, %v1652_v20, %v1648_v24 }
 0x92f   :  { %1983 = vmatmul.mubr.msk.f32.vlgmr.msra.gmra.mrb[6].mxu1 %vm388_vm6, %v1653_v25 }
 0xa02   :  { %v1722_v27 = vpop.f32.mrb[6].mxu1 }
 0xa03   :  { %v1723_v28 = vadd.f32 %v2213_v42, %v1722_v27  ;;  %v1984_v29 = vpop.f32.mrb[7].mxu1  ;;  %v1878_v42 = vld [vmem:[%s2473_s6] ss:$0 sm:$0xff] }
 0xa05   :  { %v1733_v30 = vrot.slane %v1723_v28, %v2297_v21 }
 0xa07   :  { %v1734_v31 = vcombine.high %v1733_v30, %v1733_v30  ;;  %v1741_v32 = vrot.slane %v1733_v30, %v2297_v21 }
 0xa09   :  { %v1748_v19 = vrot.slane %v1734_v31, %v2297_v21  ;;  %v1751_v33 = vadd.f32 %v1741_v32, %v2394_v43 }
 0xa0b   :  { %v1752_v34 = vadd.f32 %v1748_v19, %v2398_v45 }
 0xa0d   :  { %v1763_v35 = vcombine.low %v1751_v33, %v1752_v34 }
 0xa0f   :  { %v1770_v36 = vrot.slane %v1763_v35, %v2297_v21 }
 0xa11   :  { %v1777_v37 = vrot.slane %v1770_v36, %v2297_v21 }
 0xa13   :  { %1988 = vmatmul.mubr.msk.f32.vlgmr.msra.gmra.mrb[6].mxu0 %vm318_vm5, %v1777_v37 }
 0xae6   :  { %v1846_v38 = vpop.f32.mrb[6].mxu0 }
 0xae7   :  { %v1847_v39 = vadd.f32 %v1878_v42, %v1846_v38  ;;  %v1989_v40 = vpop.f32.mrb[7].mxu0 }
 0xae9   :  { %1851 = vst.msk [vmem:[#allocation3] sm:$0x3] %vm1850_vm10, %v1847_v39 }
 0xaea   :  { %2042 = shalt.err (!%p2039_p4)
}
 0xaeb   :  { %s2043_s10 = scalar_lea.hbm %s2474_s7, 32 }
 0xaec   :  { %p2044_p5 = scmp.ne.s32.totalorder %s2474_s7, %s2043_s10  ;;  %p2047_p6 = scmp.lt.u32.totalorder %s2043_s10, %s2474_s7 }
 0xaee   :  { %p2049_p7 = pnand %p2047_p6, %p2044_p5 }
 0xaf0   :  { %2052 = shalt.err (!%p2049_p7)
}
 0xaf1   :  { %1861 = dma.vmem_to_hbm [thread:$0]  %s1859_s29, 32, %s2474_s7, [#allocation4]  }
 0xaf2   :  { %2053 = dma.done.wait [#allocation4], 32  }
 0xaf3   :  { %2054 = vsyncadd [#allocation4], 4294967264 }
 0xaf4   :  { %1865 = vsyncpa [#allocation4], 1 }

</bundles_post_ra>
